<compile_context>
chip_gen: v6e
topology: v6e:2x2x1
jax: 0.10.0
libtpu: 0.0.40
codegen_flags: <defaults>
</compile_context>

<pallas_src>
import functools

import numpy as np

import jax
import jax.numpy as jnp
from jax.experimental import pallas as pl
from jax.experimental.pallas import tpu as pltpu


def _num_tensorcores():
    """Best-effort TensorCore count (v7x megacore); defaults to 1 (v5e/v6e)."""
    try:
        info = pltpu.get_tpu_info()
        for attr in ("num_cores", "num_tensorcores", "tensorcore_count", "core_count"):
            v = getattr(info, attr, None)
            if isinstance(v, int) and 1 <= v <= 16:
                return v
    except Exception:
        pass
    try:
        d = jax.devices()[0]
        for attr in ("num_cores", "core_count"):
            v = getattr(d, attr, None)
            if isinstance(v, int) and 1 <= v <= 16:
                return v
    except Exception:
        pass
    return 1


def _choose_layout(ny, nx, no):
    """Pick gr = cell-rows per lane-row minimizing (8,128) tile padding,
    preferring lane widths that are exact multiples of 128 (unmasked stores)."""
    lane0 = nx * no
    best_key, best_d = None, 1
    for d in range(1, ny + 1):
        if ny % d:
            continue
        L, R = d * lane0, ny // d
        tiles = (-(-R // 8)) * (-(-L // 128))      # padded (8,128) tiles per anchor
        key = (tiles, 0 if L % 128 == 0 else 1, d)
        if best_key is None or key < best_key:
            best_key, best_d = key, d
    return best_d


def _pick_row_tile(R, na, L, itemsize, bs, target_bytes=4 << 20):
    """Rows per grid step: biggest block under ~4 MiB of lane-padded VMEM (one
    step per batch for realistic heads, safe with 32 MiB scoped VMEM even with
    double-buffered in+out); optional bs==1 spatial split on multi-TC chips."""
    lane_pad = -(-L // 128) * 128
    row_bytes = max(1, na * lane_pad * itemsize)
    max_rows = max(1, target_bytes // row_bytes)
    if R <= max_rows:
        rt = R
        if bs == 1 and R >= 16 and _num_tensorcores() > 1:
            half = -(-R // 2)
            rt = min(R, -(-half // 8) * 8)        # ~half, rounded up to mult of 8
    else:
        rt = min(R, max(8, (max_rows // 8) * 8))
    return rt, -(-R // rt)


def _yolo_kernel(cid_ref, addp_ref, whm_ref, x_ref, *rest_and_out,
                 stride, gr, nc, branch):
    """Decode one (na, ry, L) lane-dense block of YOLO predictions.

    cid_ref:  (1, L)   int32  channel id of each lane (host-precomputed pattern)
    addp_ref: (1, L)   float  grid_x*stride on c==0 lanes, intra-lane-row
                              grid_y*stride on c==1 lanes, 0 elsewhere
    whm_ref:  (na,1,L) float  anchor w (c==2) / h (c==3) in pixels, 1 elsewhere
    x_ref:    (na,ry,L)       raw conv outputs (channel-last, cells*channels on lanes)
    rest_ref: (na,ry,L)       ('CE' arc only) softmax(x[...,4:]) aligned to lanes>=4
    io_ref:   (na,ry,L)       decoded predictions
    """
    io_ref = rest_and_out[-1]
    rest_ref = rest_and_out[0] if len(rest_and_out) == 2 else None

    x = x_ref[...]
    cid = cid_ref[...]                                    # (1, L)
    _, ry, _ = x.shape

    is_wh = (cid >= 2) & (cid < 4)                        # (1, L)

    # Single EUP exp pass: exp(x) on wh lanes, exp(-x) elsewhere (-> sigmoid).
    t = jnp.exp(jnp.where(is_wh, x, -x))                  # (na, ry, L)
    sig = 1.0 / (1.0 + t)                                 # sigmoid(x) on non-wh lanes

    # Grid offsets: x / intra-row-y parts come from the lane pattern; the per-row
    # y part comes from grid position + sublane iota (no in-kernel div/mod).
    row0 = pl.program_id(1) * ry
    rowf = (row0 + jax.lax.broadcasted_iota(jnp.int32, (ry, 1), 0)).astype(x.dtype)
    add = addp_ref[...] + jnp.where(cid == 1, rowf * (gr * stride), 0.0)   # (ry, L)

    xy_val = sig * stride + add                           # (sigmoid + grid) * stride
    wh_val = t * whm_ref[...]                             # exp * anchor_vec * stride

    if branch == "default":
        rest = sig
    elif branch == "BCE":
        rest = jnp.where(cid == 4, 1.0, sig)
    elif branch == "CE":
        rest = jnp.where(cid == 4, 1.0, rest_ref[...])
    else:                                                 # unknown arc: raw logits
        rest = x

    io = jnp.where(cid < 2, xy_val, jnp.where(is_wh, wh_val, rest))
    if nc == 1:
        io = jnp.where(cid == 5, 1.0, io)
    io_ref[...] = io.astype(io_ref.dtype)


def yolo_layer_forward(p, anchors, nc, img_size, arc="default", training=False):
    """JAX/Pallas equivalent of YOLOLayer.forward (ONNX_EXPORT=False).

    p: (bs, na*(nc+5), ny, nx) float32, NCHW conv output.
    Returns (io.view(bs, -1, no), p_permuted) in inference mode, p_permuted
    in training mode.  `anchors` is treated as a host constant.
    """
    bs, ch, ny, nx = p.shape
    na = int(anchors.shape[0])
    no = nc + 5
    assert ch == na * no
    stride = float(max(img_size)) / float(max(ny, nx))

    # Single data-layout change (it IS the module's second output); the kernel
    # consumes a free reshape of the same tensor.
    p_perm = jnp.transpose(p.reshape(bs, na, no, ny, nx), (0, 1, 3, 4, 2))
    if training:
        return p_perm

    # Lane-dense flat view: gr cell-rows per lane-row -> last axis is wide and
    # HBM-contiguous.
    gr = _choose_layout(ny, nx, no)
    L = gr * nx * no
    R = ny // gr
    x_in = p_perm.reshape(bs, na, R, L)                   # free reshape

    # Host-precomputed per-lane decode patterns (replace the old lane-sparse
    # gxy / anc streams; fetched once thanks to constant block index maps).
    lane = np.arange(L)
    c = lane % no
    cell = lane // no
    gx = cell % nx
    gy_in = cell // nx
    cid = jnp.asarray(c.reshape(1, L).astype(np.int32))
    addp = jnp.asarray(
        np.where(c == 0, gx * stride,
                 np.where(c == 1, gy_in * stride, 0.0)).reshape(1, L), p.dtype)
    anc = np.asarray(anchors, dtype=np.float64)           # anchor_vec*stride == anchors
    whm = jnp.asarray(
        np.where(c == 2, anc[:, 0:1],
                 np.where(c == 3, anc[:, 1:2], 1.0)).reshape(na, 1, L), p.dtype)

    branch = ("default" if "default" in arc else
              "BCE" if "BCE" in arc else
              "CE" if "CE" in arc else "raw")

    ry_tile, n_r = _pick_row_tile(R, na, L, jnp.dtype(p.dtype).itemsize, bs)

    inputs = [cid, addp, whm, x_in]
    in_specs = [
        pl.BlockSpec((1, L), lambda b, r: (0, 0)),
        pl.BlockSpec((1, L), lambda b, r: (0, 0)),
        pl.BlockSpec((na, 1, L), lambda b, r: (0, 0, 0)),
        pl.BlockSpec((None, na, ry_tile, L), lambda b, r: (b, 0, r, 0)),
    ]
    if branch == "CE":
        rest_in = jnp.concatenate(
            [jnp.zeros_like(p_perm[..., :4]),
             jax.nn.softmax(p_perm[..., 4:], axis=-1)], axis=-1).reshape(bs, na, R, L)
        inputs.append(rest_in)
        in_specs.append(
            pl.BlockSpec((None, na, ry_tile, L), lambda b, r: (b, 0, r, 0)))

    kernel = functools.partial(_yolo_kernel, stride=stride, gr=gr, nc=nc,
                               branch=branch)

    io = pl.pallas_call(
        kernel,
        out_shape=jax.ShapeDtypeStruct((bs, na, R, L), p.dtype),
        grid=(bs, n_r),
        in_specs=in_specs,
        out_specs=pl.BlockSpec((None, na, ry_tile, L), lambda b, r: (b, 0, r, 0)),
        compiler_params=pltpu.CompilerParams(
            dimension_semantics=("parallel", "parallel"),
            vmem_limit_bytes=32 * 1024 * 1024),
    )(*inputs)

    io_flat = io.reshape(bs, na * ny * nx, no)            # free reshape, no transpose
    return io_flat, p_perm


def _reference_forward(p, anchors, nc, img_size, arc="default"):
    """Pure-JAX mirror of the PyTorch inference path, for verification."""
    bs, ch, ny, nx = p.shape
    na = anchors.shape[0]
    no = nc + 5
    stride = float(max(img_size)) / float(max(ny, nx))
    pp = jnp.transpose(p.reshape(bs, na, no, ny, nx), (0, 1, 3, 4, 2))
    yv, xv = jnp.meshgrid(jnp.arange(ny), jnp.arange(nx), indexing="ij")
    grid_xy = jnp.stack([xv, yv], axis=-1).astype(p.dtype).reshape(1, 1, ny, nx, 2)
    anchor_wh = (anchors / stride).astype(p.dtype).reshape(1, na, 1, 1, 2)
    xy = (jax.nn.sigmoid(pp[..., :2]) + grid_xy) * stride
    wh = jnp.exp(pp[..., 2:4]) * anchor_wh * stride
    rest = pp[..., 4:]
    if "default" in arc:
        rest = jax.nn.sigmoid(rest)
    elif "BCE" in arc:
        rest = jnp.concatenate(
            [jnp.ones_like(rest[..., :1]), jax.nn.sigmoid(rest[..., 1:])], axis=-1)
    elif "CE" in arc:
        sm = jax.nn.softmax(rest, axis=-1)
        rest = jnp.concatenate([jnp.ones_like(sm[..., :1]), sm[..., 1:]], axis=-1)
    io = jnp.concatenate([xy, wh, rest], axis=-1)
    if nc == 1:
        io = io.at[..., 5].set(1.0)
    return io.reshape(bs, -1, no), pp


if __name__ == "__main__":
    key = jax.random.PRNGKey(0)
    anchors_all = jnp.array([[10.0, 13.0], [16.0, 30.0], [33.0, 23.0]],
                            dtype=jnp.float32)
    img_size = (512, 512)

    configs = [
        dict(bs=2, nc=3, ny=16, nx=16, na=3, arc="default"),
        dict(bs=1, nc=3, ny=8, nx=8, na=3, arc="BCE"),
        dict(bs=1, nc=3, ny=8, nx=8, na=3, arc="CE"),
        dict(bs=1, nc=1, ny=8, nx=8, na=2, arc="default"),
        dict(bs=1, nc=3, ny=32, nx=16, na=3, arc="default"),   # non-square grid
        dict(bs=2, nc=3, ny=13, nx=13, na=3, arc="default"),   # odd grid, L % 128 != 0
    ]

    for i, cfg in enumerate(configs):
        k = jax.random.fold_in(key, i)
        na, nc = cfg["na"], cfg["nc"]
        no = nc + 5
        anchors = anchors_all[:na]
        p = jax.random.normal(
            k, (cfg["bs"], na * no, cfg["ny"], cfg["nx"]), dtype=jnp.float32)

        io, p_out = yolo_layer_forward(p, anchors, nc, img_size,
                                       arc=cfg["arc"], training=False)
        jax.block_until_ready((io, p_out))

        io_ref, p_ref = _reference_forward(p, anchors, nc, img_size, arc=cfg["arc"])
        assert io.shape == (cfg["bs"], na * cfg["ny"] * cfg["nx"], no), cfg
        assert p_out.shape == (cfg["bs"], na, cfg["ny"], cfg["nx"], no), cfg
        assert jnp.allclose(p_out, p_ref, atol=1e-6, rtol=1e-6), cfg
        assert jnp.allclose(io, io_ref, atol=1e-4, rtol=1e-4), cfg

    print("KERNEL_OK")
</pallas_src>

<mosaic_0001>
module attributes {stable_mosaic.version = 11 : i64} {
  func.func @_yolo_kernel(%arg0: i32, %arg1: i32, %arg2: memref<1x128xi32, #tpu.memory_space<vmem>>, %arg3: memref<1x128xf32, #tpu.memory_space<vmem>>, %arg4: memref<3x1x128xf32, #tpu.memory_space<vmem>>, %arg5: memref<1x3x16x128xf32, #tpu.memory_space<vmem>>, %arg6: memref<1x3x16x128xf32, #tpu.memory_space<vmem>>) attributes {dimension_semantics = [#tpu.dimension_semantics<parallel>, #tpu.dimension_semantics<parallel>], iteration_bounds = array<i64: 2, 1>, scalar_prefetch = 0 : i64, scratch_operands = 0 : i64, tpu.core_type = #tpu.core_type<tc>, window_params = [{pipeline_mode = #tpu.pipeline_mode<synchronous>, transform_indices = @transform_0, window_bounds = array<i64: 1, 128>}, {pipeline_mode = #tpu.pipeline_mode<synchronous>, transform_indices = @transform_1, window_bounds = array<i64: 1, 128>}, {pipeline_mode = #tpu.pipeline_mode<synchronous>, transform_indices = @transform_2, window_bounds = array<i64: 3, 1, 128>}, {transform_indices = @transform_3, window_bounds = array<i64: 1, 3, 16, 128>}, {transform_indices = @transform_4, window_bounds = array<i64: 1, 3, 16, 128>}]} {
    %c0 = arith.constant 0 : index
    %c0_0 = arith.constant 0 : index
    %c0_1 = arith.constant 0 : index
    %c0_2 = arith.constant 0 : index
    %0 = vector.load %arg5[%c0, %c0_0, %c0_1, %c0_2] : memref<1x3x16x128xf32, #tpu.memory_space<vmem>>, vector<1x3x16x128xf32>
    %1 = vector.shape_cast %0 : vector<1x3x16x128xf32> to vector<3x16x128xf32>
    %c0_3 = arith.constant 0 : index
    %c0_4 = arith.constant 0 : index
    %2 = vector.load %arg2[%c0_3, %c0_4] : memref<1x128xi32, #tpu.memory_space<vmem>>, vector<1x128xi32>
    %c2_i32 = arith.constant 2 : i32
    %3 = vector.broadcast %c2_i32 : i32 to vector<1x128xi32>
    %4 = arith.cmpi sge, %2, %3 : vector<1x128xi32>
    %c4_i32 = arith.constant 4 : i32
    %5 = vector.broadcast %c4_i32 : i32 to vector<1x128xi32>
    %6 = arith.cmpi slt, %2, %5 : vector<1x128xi32>
    %7 = arith.andi %4, %6 : vector<1x128xi1>
    %cst = arith.constant 0.000000e+00 : f32
    %8 = vector.broadcast %cst : f32 to vector<3x16x128xf32>
    %9 = arith.subf %8, %1 : vector<3x16x128xf32>
    %10 = vector.shape_cast %7 : vector<1x128xi1> to vector<1x1x128xi1>
    %11 = vector.broadcast %10 : vector<1x1x128xi1> to vector<3x16x128xi1>
    %12 = arith.select %11, %1, %9 : vector<3x16x128xi1>, vector<3x16x128xf32>
    %13 = math.exp %12 : vector<3x16x128xf32>
    %cst_5 = arith.constant 1.000000e+00 : f32
    %14 = vector.broadcast %cst_5 : f32 to vector<3x16x128xf32>
    %15 = arith.addf %14, %13 : vector<3x16x128xf32>
    %cst_6 = arith.constant 1.000000e+00 : f32
    %16 = vector.broadcast %cst_6 : f32 to vector<3x16x128xf32>
    %17 = arith.divf %16, %15 : vector<3x16x128xf32>
    %c16_i32 = arith.constant 16 : i32
    %18 = arith.muli %arg1, %c16_i32 : i32
    %19 = tpu.iota {dimensions = array<i32: 0>} : vector<16x1xi32>
    %20 = vector.broadcast %18 : i32 to vector<16x1xi32>
    %21 = arith.addi %20, %19 : vector<16x1xi32>
    %22 = arith.sitofp %21 : vector<16x1xi32> to vector<16x1xf32>
    %c0_7 = arith.constant 0 : index
    %c0_8 = arith.constant 0 : index
    %23 = vector.load %arg3[%c0_7, %c0_8] : memref<1x128xf32, #tpu.memory_space<vmem>>, vector<1x128xf32>
    %c1_i32 = arith.constant 1 : i32
    %24 = vector.broadcast %c1_i32 : i32 to vector<1x128xi32>
    %25 = arith.cmpi eq, %2, %24 : vector<1x128xi32>
    %cst_9 = arith.constant 3.200000e+01 : f32
    %26 = vector.broadcast %cst_9 : f32 to vector<16x1xf32>
    %27 = arith.mulf %22, %26 : vector<16x1xf32>
    %cst_10 = arith.constant 0.000000e+00 : f32
    %28 = vector.shape_cast %25 : vector<1x128xi1> to vector<1x128xi1>
    %29 = vector.broadcast %28 : vector<1x128xi1> to vector<16x128xi1>
    %30 = vector.shape_cast %27 : vector<16x1xf32> to vector<16x1xf32>
    %31 = vector.broadcast %30 : vector<16x1xf32> to vector<16x128xf32>
    %32 = vector.broadcast %cst_10 : f32 to vector<16x128xf32>
    %33 = arith.select %29, %31, %32 : vector<16x128xi1>, vector<16x128xf32>
    %34 = vector.broadcast %23 : vector<1x128xf32> to vector<16x128xf32>
    %35 = arith.addf %34, %33 : vector<16x128xf32>
    %cst_11 = arith.constant 3.200000e+01 : f32
    %36 = vector.broadcast %cst_11 : f32 to vector<3x16x128xf32>
    %37 = arith.mulf %17, %36 : vector<3x16x128xf32>
    %38 = vector.shape_cast %35 : vector<16x128xf32> to vector<1x16x128xf32>
    %39 = vector.broadcast %38 : vector<1x16x128xf32> to vector<3x16x128xf32>
    %40 = arith.addf %37, %39 : vector<3x16x128xf32>
    %c0_12 = arith.constant 0 : index
    %c0_13 = arith.constant 0 : index
    %c0_14 = arith.constant 0 : index
    %41 = vector.load %arg4[%c0_12, %c0_13, %c0_14] : memref<3x1x128xf32, #tpu.memory_space<vmem>>, vector<3x1x128xf32>
    %42 = vector.broadcast %41 : vector<3x1x128xf32> to vector<3x16x128xf32>
    %43 = arith.mulf %13, %42 : vector<3x16x128xf32>
    %c2_i32_15 = arith.constant 2 : i32
    %44 = vector.broadcast %c2_i32_15 : i32 to vector<1x128xi32>
    %45 = arith.cmpi slt, %2, %44 : vector<1x128xi32>
    %46 = vector.shape_cast %7 : vector<1x128xi1> to vector<1x1x128xi1>
    %47 = vector.broadcast %46 : vector<1x1x128xi1> to vector<3x16x128xi1>
    %48 = arith.select %47, %43, %17 : vector<3x16x128xi1>, vector<3x16x128xf32>
    %49 = vector.shape_cast %45 : vector<1x128xi1> to vector<1x1x128xi1>
    %50 = vector.broadcast %49 : vector<1x1x128xi1> to vector<3x16x128xi1>
    %51 = arith.select %50, %40, %48 : vector<3x16x128xi1>, vector<3x16x128xf32>
    %c0_16 = arith.constant 0 : index
    %c0_17 = arith.constant 0 : index
    %c0_18 = arith.constant 0 : index
    %c0_19 = arith.constant 0 : index
    %52 = vector.load %arg6[%c0_16, %c0_17, %c0_18, %c0_19] : memref<1x3x16x128xf32, #tpu.memory_space<vmem>>, vector<1x3x16x128xf32>
    %53 = vector.shape_cast %52 : vector<1x3x16x128xf32> to vector<3x16x128xf32>
    %54 = vector.shape_cast %51 : vector<3x16x128xf32> to vector<1x3x16x128xf32>
    tpu.vector_store %arg6[%c0_16, %c0_17, %c0_18, %c0_19], %54 {strides = array<i32>} : memref<1x3x16x128xf32, #tpu.memory_space<vmem>>, vector<1x3x16x128xf32>,
    return
  }
  func.func @transform_0(%arg0: i32, %arg1: i32) -> (i32, i32) {
    %c0_i32 = arith.constant 0 : i32
    %c0_i32_0 = arith.constant 0 : i32
    %c0_i32_1 = arith.constant 0 : i32
    return %c0_i32, %c0_i32_0 : i32, i32
  }
  func.func @transform_1(%arg0: i32, %arg1: i32) -> (i32, i32) {
    %c0_i32 = arith.constant 0 : i32
    %c0_i32_0 = arith.constant 0 : i32
    %c0_i32_1 = arith.constant 0 : i32
    return %c0_i32, %c0_i32_0 : i32, i32
  }
  func.func @transform_2(%arg0: i32, %arg1: i32) -> (i32, i32, i32) {
    %c0_i32 = arith.constant 0 : i32
    %c0_i32_0 = arith.constant 0 : i32
    %c0_i32_1 = arith.constant 0 : i32
    %c0_i32_2 = arith.constant 0 : i32
    return %c0_i32, %c0_i32_0, %c0_i32_1 : i32, i32, i32
  }
  func.func @transform_3(%arg0: i32, %arg1: i32) -> (i32, i32, i32, i32) {
    %c0_i32 = arith.constant 0 : i32
    %c0_i32_0 = arith.constant 0 : i32
    %c0_i32_1 = arith.constant 0 : i32
    return %arg0, %c0_i32, %arg1, %c0_i32_0 : i32, i32, i32, i32
  }
  func.func @transform_4(%arg0: i32, %arg1: i32) -> (i32, i32, i32, i32) {
    %c0_i32 = arith.constant 0 : i32
    %c0_i32_0 = arith.constant 0 : i32
    %c0_i32_1 = arith.constant 0 : i32
    return %arg0, %c0_i32, %arg1, %c0_i32_0 : i32, i32, i32, i32
  }
}

</mosaic_0001>

<bundles_post_ra>
// kernel: tpu_custom_call.1
= control target key start
LH: loop header
LB: loop body
LE: loop exit
PB: predicated region body
PF: predicated region fallthrough
CT: control target
= control target key end

     0   :  { %s1136_s0 = inlined_call_operand.hbm [shape: s32[1,128], index: 0, kind: input, shape index: {}]   ;;  %s1137_s1 = inlined_call_operand.hbm [shape: f32[1,128], index: 1, kind: input, shape index: {}]   ;;  %s1138_s2 = inlined_call_operand.vmem [shape: f32[3,1,128], index: 2, kind: input, shape index: {}]   ;;  %s1139_s3 = inlined_call_operand.hbm [shape: f32[2,3,16,128], index: 3, kind: input, shape index: {}]   ;;  %s1140_s4 = inlined_call_operand.hbm [shape: f32[2,3,16,128], index: 4, kind: output, shape index: {}]  }
   0x1   :  { %1145 = sst [smem:[#allocation13_spill]] %s1136_s0 }
   0x2   :  { %1146 = sst [smem:[#allocation14_spill]] %s1137_s1 }
   0x3   :  { %9 = vsyncpa [#allocation3], 0 }
   0x4   :  { %10 = vsyncpa [#allocation6], 0 }
   0x5   :  { %11 = vsyncpa [#allocation4], 0 }
   0x6   :  { %13 = vsyncpa [#allocation4 + $0x1], 0  ;;  %s869_s15 = smov 0   ;;  %s871_s16 = smov 0  }
   0x7   :  { %s873_s17 = smov 0   ;;  %s875_s18 = smov 0  }
   0x8   :  { %s877_s19 = smov 0   ;;  %s879_s20 = smov 0  }
   0x9 LB: > { %s900_s21 = sadd.s32 4294967295, %s833_s20   ;;  %s533_s22 = sadd.s32 4294967294, %s833_s20   ;;  %s833_s20 = sphi %s879_s20, %s19_s20   ;;  %s829_s19 = sphi %s877_s19, %s1173_s19   ;;  %s825_s18 = sphi %s875_s18, %s1172_s18   ;;  %s821_s17 = sphi %s873_s17, %s1171_s17   ;;  %s817_s16 = sphi %s871_s16, %s1170_s16   ;;  %s813_s15 = sphi %s869_s15, %s1169_s15  }
   0xa   : > { %s103_s23 = sadd.s32 1, %s821_s17  ;;  %p110_p0 = scmp.ne.s32.totalorder %s821_s17, %s817_s16 }
   0xb   : > { %p111_p1 = scmp.eq.s32.totalorder %s833_s20, 0  ;;  %p116_p2 = scmp.ne.s32.totalorder %s817_s16, %s813_s15 }
   0xc   : > { %p1142_p3 = scmp.eq.s32.totalorder %s900_s21, 0  ;;  %p142_p4 = scmp.eq.s32.totalorder %s900_s21, 1 }
   0xd   : > { %p911_p5 = por %p111_p1, %p110_p0  ;;  %p148_p6 = scmp.eq.s32.totalorder %s533_s22, 1 }
   0xe   : > { %p917_p7 = por %p1142_p3, %p116_p2  ;;  %p921_p8 = por %p142_p4, %p110_p0 }
   0xf   : > { %p925_p9 = por %p148_p6, %p116_p2  ;;  %p534_p10 = scmp.ge.s32.totalorder %s833_s20, 1 }
  0x10   : > { %s1148_s25 = scalar_select %p917_p7, 1, 0 }
  0x11   : > { %s1149_s26 = scalar_select %p921_p8, 1, 0 }
  0x12   : > { %s1150_s27 = scalar_select %p925_p9, 1, 0 }
  0x13   : > { %p155_p11 = scmp.lt.s32.totalorder %s833_s20, 3  ;;  %s835_s29 = smov [#allocation2]  }
  0x14   : > { %s168_s30 = sshll.u32 %s835_s29, 4  ;;  %p582_p1 = scmp.lt.s32.totalorder %s833_s20, 2  ;;  %s169_s30 = int_to_ptr.vmem [resolvable:$true] %s168_s30 }
  0x15   : > { %p932_p13 = pnand %p534_p10, %p155_p11  ;;  %s836_s6 = smov [#allocation5]  }
  0x16   : > { %p941_p4 = pnand %p582_p1, %p911_p5  ;;  %s179_s7 = sshll.u32 %s836_s6, 4  ;;  %s180_s7 = int_to_ptr.vmem [resolvable:$true] %s179_s7 }
  0x17   : > { %s1151_s28 = scalar_select %p932_p13, 1, 0 }
  0x18   : > { %p565_p0 = pneg %p932_p13  ;;  %s676_s9 = scalar_lea.vmem %s169_s30, 16 }
  0x19   : > { %p677_p10 = scmp.ne.s32.totalorder %s169_s30, %s676_s9  ;;  %s683_s10 = scalar_lea.vmem %s169_s30, 32 }
  0x1a   : > { %p947_p2 = pnand %p565_p0, %p1142_p3  ;;  %p684_p1 = scmp.lt.s32.totalorder %s169_s30, %s169_s30 }
  0x1b   : > { %p685_p12 = scmp.lt.s32.totalorder %s683_s10, %s676_s9 }
  0x1c   : > { %p667_p6 = pneg %p947_p2 }
  0x1d   : > { %p686_p9 = por %p685_p12, %p684_p1 }
  0x1e   : > { %p679_p5 = pnand %p677_p10, %p667_p6 }
  0x20   : > { %p680_p11 = pneg %p679_p5 }
  0x22   : > { %p687_p8 = pnand %p686_p9, %p680_p11 }
  0x24   : > { %690 = shalt.err (!%p687_p8)
}
  0x25   : > { %s1154_s0 = sld [smem:[#allocation13_spill]]  ;;  %s702_s13 = scalar_lea.vmem %s180_s7, 16 }
  0x26   : > { %p703_p0 = scmp.ne.s32.totalorder %s180_s7, %s702_s13  ;;  %s709_s14 = scalar_lea.vmem %s180_s7, 32 }
  0x27   : > { %p710_p5 = scmp.lt.s32.totalorder %s180_s7, %s180_s7  ;;  %p711_p7 = scmp.lt.s32.totalorder %s709_s14, %s702_s13 }
  0x28   : > { %p705_p3 = pnand %p703_p0, %p667_p6 }
  0x29   : > { %p712_p13 = por %p711_p7, %p710_p5 }
  0x2a   : > { %p706_p10 = pneg %p705_p3 }
  0x2b   : > { %568 = dma.hbm_to_vmem [thread:$0]  (!%p947_p2), %s1154_s0, 16, %s169_s30, [#allocation3]  }
  0x2c   : > { %p713_p12 = pnand %p712_p13, %p706_p10 }
  0x2e   : > { %716 = shalt.err (!%p713_p12)
}
  0x2f   : > { %s1155_s1 = sld [smem:[#allocation14_spill]]  ;;  %s31_s29 = sadd.s32 1, %s829_s19 }
  0x30   : > { %s193_s30 = sand.u32 1, %s833_s20   ;;  %p33_p3 = scmp.ge.s32.totalorder %s31_s29, 2 }
  0x31   : > { %s195_s6 = sand.u32 1, %s821_s17   ;;  %s550_s9 = smul.u32 768, %s829_s19 }
  0x32   : > { %s1175_s29 = smov (%p33_p3, %s31_s29), 0  ;;  %s549_s8 = smul.u32 48, %s195_s6 }
  0x33   : > { %s205_s12 = scalar_lea.hbm %s1139_s3, %s550_s9  ;;  %s98_s13 = ssub.s32 %s829_s19, %s1175_s29 }
  0x34   : > { %p101_p7 = scmp.eq.s32.totalorder %s98_s13, 0  ;;  %s197_s14 = scalar_lea.vmem [#allocation7], %s549_s8 }
  0x35   : > { %571 = dma.hbm_to_vmem [thread:$0]  (!%p947_p2), %s1155_s1, 16, %s180_s7, [#allocation6]  }
  0x36   : > { %s206_s22 = sshll.u32 %s197_s14, 4  ;;  %s194_s24 = scalar_lea.sflag [#allocation3], %s193_s30  ;;  %s207_s22 = int_to_ptr.vmem [resolvable:$true] %s206_s22 }
  0x37   : > { %s983_s7 = scalar_select %p101_p7, %s821_s17, %s103_s23  }
  0x38   : > { %p719_p8 = pneg %p941_p4  ;;  %s730_s0 = scalar_lea.vmem %s207_s22, 768 }
  0x39   : > { %p731_p9 = scmp.ne.s32.totalorder %s207_s22, %s730_s0  ;;  %s837_s6 = smov [#allocation7]  }
  0x3a   : > { %s735_s1 = sshll.u32 %s837_s6, 4  ;;  %s736_s1 = int_to_ptr.vmem [resolvable:$false] %s735_s1 }
  0x3b   : > { %p733_p13 = pnand %p731_p9, %p719_p8  ;;  %s737_s10 = scalar_lea.vmem %s736_s1, 1536 }
  0x3c   : > { %p738_p6 = scmp.lt.s32.totalorder %s207_s22, %s736_s1  ;;  %p739_p11 = scmp.lt.s32.totalorder %s737_s10, %s730_s0 }
  0x3d   : > { %p734_p2 = pneg %p733_p13 }
  0x3e   : > { %p740_p1 = por %p739_p11, %p738_p6 }
  0x40   : > { %p741_p0 = pnand %p740_p1, %p734_p2 }
  0x42   : > { %744 = shalt.err (!%p741_p0)
}
  0x43   : > { %s838_s9 = smov 128   ;;  %s839_s23 = smov 8  }
  0x44   : > { %575 = dma.hbm_to_vmem [thread:$0]  (!%p941_p4), %s205_s12, 768, %s207_s22, %s194_s24, %s838_s9, %s838_s9, %s839_s23  }
  0x45   : > { %p1156_p10 = scmp.ne.s32.totalorder %s1151_s28, 0 }
  0x46   : > { %p1157_p5 = scmp.eq.s32.totalorder (!%p1156_p10), %s900_s21, 0 }
  0x47   : > { %218 = sbr.rel (%p1156_p10) target bundleno = 151 (0x97), region = 36 }
  0x4c   : > { %796 = dma.done.wait (%p1157_p5), [#allocation3], 16   ;;  %p1158_p12 = pmov %p1157_p5 }
  0x4d   : > { %p1159_p3 = pmov %p1157_p5 }
  0x4e   : > { %798 = vsyncadd (%p1158_p12), [#allocation3], 4294967280 }
  0x4f   : > { %800 = dma.done.wait (%p1159_p3), [#allocation6], 16   ;;  %p1160_p7 = pmov %p1159_p3 }
  0x50   : > { %s228_s0 = sand.u32 1, %s900_s21   ;;  %s230_s1 = sand.u32 1, %s817_s16  }
  0x51   : > { %802 = vsyncadd (%p1160_p7), [#allocation6], 4294967280  ;;  %s1003_s28 = smul.u32 48, %s230_s1  ;;  %s229_s5 = scalar_lea.sflag [#allocation3], %s228_s0 }
  0x52   : > { %p1161_p4 = scmp.ne.s32.totalorder %s1148_s25, 0 }
  0x53   : > { %s232_s30 = scalar_lea.vmem [#allocation7], %s1003_s28 }
  0x54   : > { %804 = dma.done.wait (%p1161_p4), %s229_s5, 768  }
  0x55   : > { %806 = vsyncadd (%p1161_p4), %s229_s5, 4294966528  ;;  %v276_v0 = vlaneseq  ;;  %v259_v2 = vld [vmem:[%s232_s30] sm:$0xff]  ;;  %v1012_v3 = vld [vmem:[#allocation2] sm:$0x1]  ;;  %v840_v8 = vmov 0   ;;  %s256_s14 = scalar_lea.vmem [#allocation8], %s1003_s28 }
  0x56   : > { %vm266_vm0 = vcmp.ge.s32.totalorder %v1012_v3, 2  ;;  %vm267_vm1 = vcmp.lt.s32.totalorder %v1012_v3, 4  ;;  %v260_v5 = vld [vmem:[%s232_s30 + $0x8] sm:$0xff]  ;;  %v261_v6 = vld [vmem:[%s232_s30 + $0x10] sm:$0xff]  ;;  %v269_v7 = vsub.f32 0.0, %v259_v2  ;;  %v262_v11 = vld [vmem:[%s232_s30 + $0x18] sm:$0xff] }
  0x57   : > { %v1010_v1 = vshrl.u32 %v276_v0, 7  ;;  %vm268_vm2 = vmand %vm266_vm0, %vm267_vm1  ;;  %v270_v10 = vsub.f32 0.0, %v260_v5  ;;  %v271_v13 = vsub.f32 0.0, %v261_v6  ;;  %v272_v14 = vsub.f32 0.0, %v262_v11  ;;  %v263_v15 = vld [vmem:[%s232_s30 + $0x20] sm:$0xff]  ;;  %v264_v16 = vld [vmem:[%s232_s30 + $0x28] sm:$0xff] }
  0x58   : > { %v275_v9 = vsel %vm268_vm2, 1, %v840_v8  ;;  %v273_v17 = vsub.f32 0.0, %v263_v15  ;;  %v274_v18 = vsub.f32 0.0, %v264_v16  ;;  %vm327_vm4 = vcmp.eq.s32.totalorder %v1012_v3, 1  ;;  %v543_v51 = vld [vmem:[%s1138_s2] ss:$0 sm:$0xff] }
  0x59   : > { %v1015_v4 = vsub.s32 0, %v1010_v1  ;;  %v320_v35 = vadd.s32 8, %v1010_v1  ;;  %v330_v37 = vsel %vm327_vm4, 1, %v840_v8  ;;  %v324_v42 = vcvt.s32.f32 %v1010_v1  ;;  %v542_v53 = vld [vmem:[#allocation5] ss:$0 sm:$0xff]  ;;  %s426_s22 = sshll.u32 %s256_s14, 4  ;;  %s1075_s22 = int_to_ptr.vmem [resolvable:$true] %s426_s22 }
  0x5a   : > { %vm385_vm5 = vcmp.lt.s32.totalorder %v1012_v3, 2  ;;  %v544_v56 = vld [vmem:[%s1138_s2 + $0x1] ss:$0 sm:$0xff]  ;;  %v545_v61 = vld [vmem:[%s1138_s2 + $0x2] ss:$0 sm:$0xff]  ;;  %s552_s24 = smul.u32 768, %s825_s18 }
  0x5b   : > { %v279_v12 = vrot.slane %v275_v9, %v1015_v4  ;;  %v334_v45 = vrot.slane %v330_v37, %v1015_v4  ;;  %v325_v46 = vcvt.s32.f32 %v320_v35  ;;  %v328_v49 = vmul.f32 32.0, %v324_v42  ;;  %s1090_s9 = scalar_lea.sflag [#allocation4], %s230_s1  ;;  %s745_s23 = scalar_lea.vmem %s1075_s22, 768 }
  0x5c   : > { %v392_v52 = vsel %vm385_vm5, 1, %v840_v8  ;;  %s1084_s10 = scalar_lea.hbm %s1140_s4, %s552_s24  ;;  %p746_p8 = scmp.ne.s32.totalorder %s1075_s22, %s745_s23 }
  0x5d   : > { %vm1020_vm3 = vcmp.eq.s32.totalorder %v279_v12, 1  ;;  %vm335_vm6 = vcmp.eq.s32.totalorder %v334_v45, 1  ;;  %v329_v50 = vmul.f32 32.0, %v325_v46  ;;  %v396_v58 = vrot.slane %v392_v52, %v1015_v4  ;;  %p1166_p9 = scmp.ne.s32.totalorder %s1149_s26, 0  ;;  %s841_s0 = smov [#allocation8]  }
  0x5e   : > { %v281_v20 = vsel %vm1020_vm3, %v259_v2, %v269_v7  ;;  %v282_v21 = vsel %vm1020_vm3, %v260_v5, %v270_v10  ;;  %v283_v24 = vsel %vm1020_vm3, %v261_v6, %v271_v13  ;;  %v284_v25 = vsel %vm1020_vm3, %v262_v11, %v272_v14  ;;  %s749_s28 = sshll.u32 %s841_s0, 4  ;;  %s750_s28 = int_to_ptr.vmem [resolvable:$false] %s749_s28 }
  0x5f   : > { %v287_v22 = vmul.f32 1.442695, %v281_v20  ;;  %v289_v23 = vmul.f32 1.442695, %v282_v21  ;;  %v291_v26 = vmul.f32 1.442695, %v283_v24  ;;  %v285_v28 = vsel %vm1020_vm3, %v263_v15, %v273_v17  ;;  %p747_p13 = pnand %p746_p8, %p1166_p9  ;;  %p752_p6 = scmp.lt.s32.totalorder %s1075_s22, %s750_s28 }
  0x60   : > { %v293_v27 = vmul.f32 1.442695, %v284_v25  ;;  %v286_v29 = vsel %vm1020_vm3, %v264_v16, %v274_v18  ;;  %v295_v30 = vmul.f32 1.442695, %v285_v28  ;;  %v336_v54 = vsel %vm335_vm6, %v328_v49, 0.0  ;;  %s751_s5 = scalar_lea.vmem %s750_s28, 1536 }
  0x61   : > { %641 = vpow2.f32 %v287_v22  ;;  %v297_v31 = vmul.f32 1.442695, %v286_v29  ;;  %v337_v55 = vsel %vm335_vm6, %v329_v50, 0.0  ;;  %v344_v59 = vadd.f32 %v542_v53, %v336_v54  ;;  %p748_p2 = pneg %p747_p13  ;;  %p753_p11 = scmp.lt.s32.totalorder %s751_s5, %s745_s23 }
  0x62   : > { %643 = vpow2.f32 %v289_v23  ;;  %v345_v63 = vadd.f32 %v542_v53, %v337_v55  ;;  %vm1053_vm7 = vcmp.eq.s32.totalorder %v396_v58, 1 }
  0x63   : > { %645 = vpow2.f32 %v291_v26  ;;  %p754_p1 = por %p753_p11, %p752_p6 }
  0x64   : > { %647 = vpow2.f32 %v293_v27 }
  0x65   : > { %649 = vpow2.f32 %v295_v30  ;;  %p755_p0 = pnand %p754_p1, %p748_p2 }
  0x66   : > { %651 = vpow2.f32 %v297_v31 }
  0x6e   : > { %v642_v32 = vpop.eup %641 }
  0x6f   : > { %v644_v33 = vpop.eup %643  ;;  %v299_v34 = vadd.f32 1.0, %v642_v32  ;;  %v379_v57 = vmul.f32 %v642_v32, %v543_v51 }
  0x70   : > { %v646_v36 = vpop.eup %645  ;;  %v300_v38 = vadd.f32 1.0, %v644_v33  ;;  %v380_v60 = vmul.f32 %v644_v33, %v543_v51 }
  0x71   : > { %v648_v39 = vpop.eup %647  ;;  %653 = vrcp.f32 %v299_v34  ;;  %v301_v40 = vadd.f32 1.0, %v646_v36  ;;  %v381_v0 = vmul.f32 %v646_v36, %v544_v56 }
  0x72   : > { %v650_v41 = vpop.eup %649  ;;  %655 = vrcp.f32 %v300_v38  ;;  %v302_v43 = vadd.f32 1.0, %v648_v39  ;;  %v382_v3 = vmul.f32 %v648_v39, %v544_v56 }
  0x73   : > { %v652_v44 = vpop.eup %651  ;;  %657 = vrcp.f32 %v301_v40  ;;  %v303_v47 = vadd.f32 1.0, %v650_v41  ;;  %v383_v8 = vmul.f32 %v650_v41, %v545_v61 }
  0x74   : > { %659 = vrcp.f32 %v302_v43  ;;  %v304_v48 = vadd.f32 1.0, %v652_v44  ;;  %v384_v13 = vmul.f32 %v652_v44, %v545_v61 }
  0x75   : > { %661 = vrcp.f32 %v303_v47 }
  0x76   : > { %663 = vrcp.f32 %v304_v48 }
  0x7e   : > { %v654_v62 = vpop.eup %653 }
  0x7f   : > { %v656_v1 = vpop.eup %655  ;;  %v346_v2 = vmul.f32 32.0, %v654_v62  ;;  %v386_v6 = vsel %vm1020_vm3, %v379_v57, %v654_v62 }
  0x80   : > { %v658_v5 = vpop.eup %657  ;;  %v347_v4 = vmul.f32 32.0, %v656_v1  ;;  %v387_v11 = vsel %vm1020_vm3, %v380_v60, %v656_v1 }
  0x81   : > { %v660_v9 = vpop.eup %659  ;;  %v352_v10 = vadd.f32 %v346_v2, %v344_v59  ;;  %v348_v12 = vmul.f32 32.0, %v658_v5  ;;  %v388_v16 = vsel %vm1020_vm3, %v381_v0, %v658_v5 }
  0x82   : > { %v662_v14 = vpop.eup %661  ;;  %v353_v15 = vadd.f32 %v347_v4, %v345_v63  ;;  %v349_v17 = vmul.f32 32.0, %v660_v9  ;;  %v389_v22 = vsel %vm1020_vm3, %v382_v3, %v660_v9 }
  0x83   : > { %v664_v18 = vpop.eup %663  ;;  %v398_v20 = vsel %vm1053_vm7, %v352_v10, %v386_v6  ;;  %v354_v21 = vadd.f32 %v348_v12, %v344_v59  ;;  %v350_v23 = vmul.f32 32.0, %v662_v14  ;;  %v390_v26 = vsel %vm1020_vm3, %v383_v8, %v662_v14 }
  0x84   : > { %404 = vst [vmem:[%s256_s14] sm:$0xff] %v398_v20  ;;  %v399_v24 = vsel %vm1053_vm7, %v353_v15, %v387_v11  ;;  %v355_v25 = vadd.f32 %v349_v17, %v345_v63  ;;  %v351_v27 = vmul.f32 32.0, %v664_v18  ;;  %v391_v30 = vsel %vm1020_vm3, %v384_v13, %v664_v18 }
  0x85   : > { %405 = vst [vmem:[%s256_s14 + $0x8] sm:$0xff] %v399_v24  ;;  %v400_v28 = vsel %vm1053_vm7, %v354_v21, %v388_v16  ;;  %v356_v29 = vadd.f32 %v350_v23, %v344_v59 }
  0x86   : > { %406 = vst [vmem:[%s256_s14 + $0x10] sm:$0xff] %v400_v28  ;;  %v401_v31 = vsel %vm1053_vm7, %v355_v25, %v389_v22  ;;  %v357_v32 = vadd.f32 %v351_v27, %v345_v63 }
  0x87   : > { %407 = vst [vmem:[%s256_s14 + $0x18] sm:$0xff] %v401_v31  ;;  %v402_v33 = vsel %vm1053_vm7, %v356_v29, %v390_v26 }
  0x88   : > { %408 = vst [vmem:[%s256_s14 + $0x20] sm:$0xff] %v402_v33  ;;  %v403_v19 = vsel %vm1053_vm7, %v357_v32, %v391_v30 }
  0x89   : > { %409 = vst [vmem:[%s256_s14 + $0x28] sm:$0xff] %v403_v19 }
  0x8a   : > { %758 = shalt.err (!%p755_p0)
}
  0x8b   : > { %s759_s1 = scalar_lea.hbm %s1084_s10, 768  ;;  %s763_s25 = scalar_lea.hbm %s1140_s4, 1536 }
  0x8c   : > { %p760_p10 = scmp.ne.s32.totalorder %s1084_s10, %s759_s1  ;;  %p764_p3 = scmp.lt.s32.totalorder %s1084_s10, %s1140_s4 }
  0x8d   : > { %p765_p7 = scmp.lt.s32.totalorder %s763_s25, %s759_s1 }
  0x8e   : > { %p761_p5 = pnand %p760_p10, %p1166_p9 }
  0x8f   : > { %p766_p4 = por %p765_p7, %p764_p3 }
  0x90   : > { %p762_p12 = pneg %p761_p5 }
  0x92   : > { %p767_p8 = pnand %p766_p4, %p762_p12 }
  0x94   : > { %770 = shalt.err (!%p767_p8)
}
  0x95   : > { %s842_s12 = smov 128   ;;  %s843_s13 = smov 8  }
  0x96   : > { %563 = dma.vmem_to_hbm [thread:$0]  (%p1166_p9), %s1075_s22, 768, %s1084_s10, %s1090_s9, %s842_s12, %s842_s12, %s843_s13  }
  0x97 PF: > { %s441_s14 = sand.u32 1, %s813_s15   ;;  %p1167_p13 = scmp.ne.s32.totalorder %s1150_s27, 0 }
  0x98   : > { %p1168_p2 = scmp.ge.s32.totalorder %s833_s20, 2  ;;  %s442_s24 = scalar_lea.sflag [#allocation4], %s441_s14 }
  0x9a   : > { %p577_p6 = pnand %p1168_p2, %p1167_p13 }
  0x9c   : > { %p578_p11 = pneg %p577_p6 }
  0x9e   : > { %808 = dma.done.wait (%p578_p11), %s442_s24, 768  }
  0x9f   : > { %810 = vsyncadd (%p578_p11), %s442_s24, 4294966528  ;;  %s19_s20 = sadd.s32 1, %s833_s20   ;;  %s1169_s15 = smov %s817_s16 }
  0xa0   : > { %p16_p1 = scmp.ge.s32.totalorder %s19_s20, 4   ;;  %s1170_s16 = smov %s821_s17 }
  0xa1   : > { %s1171_s17 = smov %s983_s7  ;;  %s1172_s18 = smov %s829_s19 }
  0xa2   : > { %s1173_s19 = smov %s1175_s29  ;;  %18 = sbr.rel (!%p16_p1) target bundleno = 9 (0x9), region = 88 }
  0xa7   :  { %447 = vsyncpa [#allocation3], 1 }
  0xa8   :  { %449 = vsyncpa [#allocation3 + $0x1], 1 }
  0xa9   :  { %450 = vsyncpa [#allocation6], 1 }
  0xaa   :  { %451 = vsyncpa [#allocation4], 1 }
  0xab   :  { %453 = vsyncpa [#allocation4 + $0x1], 1 }

</bundles_post_ra>
